<compile_context>
chip_gen: v5e
topology: v5e:2x2
jax: 0.10.0
libtpu: 0.0.40
codegen_flags: <defaults>
</compile_context>

<pallas_src>
import functools

import jax
import jax.numpy as jnp
from jax.experimental import pallas as pl
from jax.experimental.pallas import tpu as pltpu

EPS = 1e-10


def _round_up(x, m):
    return (x + m - 1) // m * m


def focal_loss_kernel(x_ref, t_ref, out_ref, *, n_total, gamma):
    # x_ref  : [TM, C] native dtype (VMEM tile)
    # t_ref  : [TM, 1] int32
    # out_ref: [1, 128] f32 -- this tile's partial loss sum, broadcast over lanes
    i = pl.program_id(0)
    x = x_ref[...].astype(jnp.float32)
    t = t_ref[...]
    tm, c = x.shape

    # Mask for the ragged last tile (out-of-bounds rows hold unspecified data).
    row = jax.lax.broadcasted_iota(jnp.int32, (tm, 1), 0) + i * tm
    valid = row < n_total
    x = jnp.where(valid, x, 0.0)
    t = jnp.where(valid, t, 0)

    # Numerically stable softmax pieces; only exp touches the full tile.
    m = jnp.max(x, axis=1, keepdims=True)            # [TM, 1]
    e = jnp.exp(x - m)                               # [TM, C]
    denom = jnp.sum(e, axis=1, keepdims=True)        # [TM, 1]

    # Gather the target column via a lane-iota one-hot BEFORE log/pow/div.
    col = jax.lax.broadcasted_iota(jnp.int32, (tm, c), 1)
    e_t = jnp.sum(jnp.where(col == t, e, 0.0), axis=1, keepdims=True)  # [TM, 1]

    p_t = e_t / denom                                # [TM, 1] divides only
    q = 1.0 - p_t
    if gamma == 2:                                   # static: lowers to a VPU mul
        mod = q * q
    elif gamma == 1:
        mod = q
    else:
        mod = q ** gamma
    loss_row = -mod * jnp.log(p_t + EPS)             # [TM, 1] logs only
    loss_row = jnp.where(valid, loss_row, 0.0)

    tile_sum = jnp.sum(loss_row)
    # Lane-dense, unmasked store; wrapper reads lane 0 of each tile block.
    out_ref[...] = jnp.full(out_ref.shape, tile_sum, dtype=jnp.float32)


def focal_loss(x, target, gamma=2, tm=None):
    """x: [N, C] float (f32/bf16), target: [N] integer class ids. Returns scalar f32."""
    n, c = x.shape
    t2d = target.astype(jnp.int32).reshape(n, 1)

    # Row alignment: sub-32-bit dtypes pack along sublanes (bf16 -> 16-row tiles).
    row_align = 8 * max(1, 4 // x.dtype.itemsize)
    if tm is None:
        # Largest row tile keeping the double-buffered x tile under ~8 MiB
        # (ample headroom inside v7x's 32 MiB scoped VMEM limit).
        bytes_per_row = c * x.dtype.itemsize
        cap = max(row_align,
                  (8 * 1024 * 1024 // (2 * bytes_per_row)) // row_align * row_align)
        tm = int(min(1024, cap, _round_up(n, row_align)))
    tm = int(_round_up(max(int(tm), row_align), row_align))
    num_tiles = int(pl.cdiv(n, tm))

    kernel = functools.partial(focal_loss_kernel, n_total=n, gamma=gamma)
    partials = pl.pallas_call(
        kernel,
        out_shape=jax.ShapeDtypeStruct((1, num_tiles * 128), jnp.float32),
        grid=(num_tiles,),
        in_specs=[
            pl.BlockSpec((tm, c), lambda i: (i, 0)),
            pl.BlockSpec((tm, 1), lambda i: (i, 0)),
        ],
        out_specs=pl.BlockSpec((1, 128), lambda i: (0, i)),
        compiler_params=pltpu.CompilerParams(
            dimension_semantics=("parallel",),
            vmem_limit_bytes=32 * 1024 * 1024,
        ),
    )(x, t2d)
    # One live value (lane 0) per tile; tiny reduction + exact mean in the wrapper.
    total = jnp.sum(partials.reshape(num_tiles, 128)[:, 0])
    return total * jnp.float32(1.0 / n)


def focal_loss_ref(x, target, gamma=2):
    """Pure-JAX reference for correctness checking."""
    p = jax.nn.softmax(x.astype(jnp.float32), axis=1)
    logits = (1.0 - p) ** gamma * jnp.log(p + EPS)
    picked = jnp.take_along_axis(logits, target.astype(jnp.int32)[:, None], axis=1)
    return jnp.mean(-picked)


if __name__ == "__main__":
    key = jax.random.PRNGKey(0)
    kx, kt = jax.random.split(key)
    N, C = 20, 32  # N not a multiple of the row tile -> exercises ragged masking
    x = jax.random.normal(kx, (N, C), dtype=jnp.float32)
    target = jax.random.randint(kt, (N,), 0, C, dtype=jnp.int32)

    ref = focal_loss_ref(x, target)

    # Default tile size (single tile, masked tail rows).
    loss = focal_loss(x, target)
    jax.block_until_ready(loss)
    assert jnp.allclose(loss, ref, rtol=2e-5, atol=1e-6), (loss, ref)

    # Forced small tile -> multi-step grid with a ragged last tile.
    loss_tiled = focal_loss(x, target, tm=8)
    jax.block_until_ready(loss_tiled)
    assert jnp.allclose(loss_tiled, ref, rtol=2e-5, atol=1e-6), (loss_tiled, ref)

    # Native bf16 input goes through the DMA un-upcast; math is f32 in-kernel.
    x_bf16 = x.astype(jnp.bfloat16)
    loss_bf16 = focal_loss(x_bf16, target)
    jax.block_until_ready(loss_bf16)
    ref_bf16 = focal_loss_ref(x_bf16.astype(jnp.float32), target)
    assert jnp.allclose(loss_bf16, ref_bf16, rtol=1e-4, atol=1e-5), (loss_bf16, ref_bf16)

    print("KERNEL_OK")
</pallas_src>

<mosaic_0001>
module attributes {stable_mosaic.version = 11 : i64} {
  func.func @focal_loss_kernel(%arg0: i32, %arg1: memref<24x32xf32, #tpu.memory_space<vmem>>, %arg2: memref<24x1xi32, #tpu.memory_space<vmem>>, %arg3: memref<1x128xf32, #tpu.memory_space<vmem>>) attributes {dimension_semantics = [#tpu.dimension_semantics<parallel>], iteration_bounds = array<i64: 1>, scalar_prefetch = 0 : i64, scratch_operands = 0 : i64, tpu.core_type = #tpu.core_type<tc>, window_params = [{transform_indices = @transform_0, window_bounds = array<i64: 24, 32>}, {transform_indices = @transform_1, window_bounds = array<i64: 24, 1>}, {transform_indices = @transform_2, window_bounds = array<i64: 1, 128>}]} {
    %c0 = arith.constant 0 : index
    %c0_0 = arith.constant 0 : index
    %0 = vector.load %arg1[%c0, %c0_0] : memref<24x32xf32, #tpu.memory_space<vmem>>, vector<24x32xf32>
    %c0_1 = arith.constant 0 : index
    %c0_2 = arith.constant 0 : index
    %1 = vector.load %arg2[%c0_1, %c0_2] : memref<24x1xi32, #tpu.memory_space<vmem>>, vector<24x1xi32>
    %2 = tpu.iota {dimensions = array<i32: 0>} : vector<24x1xi32>
    %c24_i32 = arith.constant 24 : i32
    %3 = arith.muli %arg0, %c24_i32 : i32
    %4 = vector.broadcast %3 : i32 to vector<24x1xi32>
    %5 = arith.addi %2, %4 : vector<24x1xi32>
    %c20_i32 = arith.constant 20 : i32
    %6 = vector.broadcast %c20_i32 : i32 to vector<24x1xi32>
    %7 = arith.cmpi slt, %5, %6 : vector<24x1xi32>
    %cst = arith.constant 0.000000e+00 : f32
    %8 = vector.shape_cast %7 : vector<24x1xi1> to vector<24x1xi1>
    %9 = vector.broadcast %8 : vector<24x1xi1> to vector<24x32xi1>
    %10 = vector.broadcast %cst : f32 to vector<24x32xf32>
    %11 = arith.select %9, %0, %10 : vector<24x32xi1>, vector<24x32xf32>
    %c0_i32 = arith.constant 0 : i32
    %12 = vector.broadcast %c0_i32 : i32 to vector<24x1xi32>
    %13 = arith.select %7, %1, %12 : vector<24x1xi1>, vector<24x1xi32>
    %cst_3 = arith.constant dense<0xFF800000> : vector<24xf32>
    %14 = vector.multi_reduction <maximumf>, %11, %cst_3 [1] : vector<24x32xf32> to vector<24xf32>
    %15 = vector.shape_cast %14 : vector<24xf32> to vector<24x1xf32>
    %16 = vector.broadcast %15 : vector<24x1xf32> to vector<24x32xf32>
    %17 = arith.subf %11, %16 : vector<24x32xf32>
    %18 = math.exp %17 : vector<24x32xf32>
    %cst_4 = arith.constant dense<0.000000e+00> : vector<24xf32>
    %19 = vector.multi_reduction <add>, %18, %cst_4 [1] : vector<24x32xf32> to vector<24xf32>
    %20 = vector.shape_cast %19 : vector<24xf32> to vector<24x1xf32>
    %21 = tpu.iota {dimensions = array<i32: 1>} : vector<24x32xi32>
    %22 = vector.broadcast %13 : vector<24x1xi32> to vector<24x32xi32>
    %23 = arith.cmpi eq, %21, %22 : vector<24x32xi32>
    %cst_5 = arith.constant 0.000000e+00 : f32
    %24 = vector.broadcast %cst_5 : f32 to vector<24x32xf32>
    %25 = arith.select %23, %18, %24 : vector<24x32xi1>, vector<24x32xf32>
    %cst_6 = arith.constant dense<0.000000e+00> : vector<24xf32>
    %26 = vector.multi_reduction <add>, %25, %cst_6 [1] : vector<24x32xf32> to vector<24xf32>
    %27 = vector.shape_cast %26 : vector<24xf32> to vector<24x1xf32>
    %28 = arith.divf %27, %20 : vector<24x1xf32>
    %cst_7 = arith.constant 1.000000e+00 : f32
    %29 = vector.broadcast %cst_7 : f32 to vector<24x1xf32>
    %30 = arith.subf %29, %28 : vector<24x1xf32>
    %31 = arith.mulf %30, %30 : vector<24x1xf32>
    %cst_8 = arith.constant 0.000000e+00 : f32
    %32 = vector.broadcast %cst_8 : f32 to vector<24x1xf32>
    %33 = arith.subf %32, %31 : vector<24x1xf32>
    %cst_9 = arith.constant 1.000000e-10 : f32
    %34 = vector.broadcast %cst_9 : f32 to vector<24x1xf32>
    %35 = arith.addf %28, %34 : vector<24x1xf32>
    %36 = math.log %35 : vector<24x1xf32>
    %37 = arith.mulf %33, %36 : vector<24x1xf32>
    %cst_10 = arith.constant 0.000000e+00 : f32
    %38 = vector.broadcast %cst_10 : f32 to vector<24x1xf32>
    %39 = arith.select %7, %37, %38 : vector<24x1xi1>, vector<24x1xf32>
    %40 = vector.shape_cast %39 : vector<24x1xf32> to vector<1x24x1xf32>
    %cst_11 = arith.constant dense<0.000000e+00> : vector<1xf32>
    %41 = vector.multi_reduction <add>, %40, %cst_11 [1, 2] : vector<1x24x1xf32> to vector<1xf32>
    %42 = vector.shape_cast %41 : vector<1xf32> to vector<1x1x1xf32>
    %43 = vector.extract %42[0, 0, 0] : f32 from vector<1x1x1xf32>
    %44 = vector.broadcast %43 : f32 to vector<1x128xf32>
    %c0_12 = arith.constant 0 : index
    %c0_13 = arith.constant 0 : index
    %45 = vector.load %arg3[%c0_12, %c0_13] : memref<1x128xf32, #tpu.memory_space<vmem>>, vector<1x128xf32>
    tpu.vector_store %arg3[%c0_12, %c0_13], %44 {strides = array<i32>} : memref<1x128xf32, #tpu.memory_space<vmem>>, vector<1x128xf32>,
    return
  }
  func.func @transform_0(%arg0: i32) -> (i32, i32) {
    %c0_i32 = arith.constant 0 : i32
    %c0_i32_0 = arith.constant 0 : i32
    return %arg0, %c0_i32 : i32, i32
  }
  func.func @transform_1(%arg0: i32) -> (i32, i32) {
    %c0_i32 = arith.constant 0 : i32
    %c0_i32_0 = arith.constant 0 : i32
    return %arg0, %c0_i32 : i32, i32
  }
  func.func @transform_2(%arg0: i32) -> (i32, i32) {
    %c0_i32 = arith.constant 0 : i32
    %c0_i32_0 = arith.constant 0 : i32
    return %c0_i32, %arg0 : i32, i32
  }
}

</mosaic_0001>

<bundles_post_ra>
// kernel: tpu_custom_call.1
= control target key start
LH: loop header
LB: loop body
LE: loop exit
PB: predicated region body
PF: predicated region fallthrough
CT: control target
= control target key end

     0   :  { %vm42_vm0 = vcmask 261120   ;;  %v18_v1 = vlaneseq  ;;  %v249_v3 = vmov 0   ;;  %s305_s0 = inlined_call_operand.vmem [shape: f32[20,32], index: 0, kind: input, shape index: {}]   ;;  %s306_s1 = inlined_call_operand.vmem [shape: s32[20,1], index: 1, kind: input, shape index: {}]   ;;  %s307_s2 = inlined_call_operand.hbm [shape: f32[1,128], index: 2, kind: output, shape index: {}]  }
   0x1   :  { %v12_v0 = vld [vmem:[%s305_s0] sm:$0xff]  ;;  %202 = vset.pattern.permute.xlu1 %v249_v3  ;;  %203 = vset.pattern.permute.xlu2 %v249_v3 }
   0x2   :  { %v43_v2 = vsel %vm42_vm0, %v12_v0, -inf }
   0x3   :  { %7 = vsyncpa [#allocation3], 0  ;;  %44 = vmax.xlane.f32.xlu0 %v43_v2  ;;  %v19_v4 = vshrl.u32 %v18_v1, 7  ;;  %v16_v5 = vld [vmem:[%s306_s1 + $0x8] sm:$0xff]  ;;  %v14_v6 = vld [vmem:[%s305_s0 + $0x10] sm:$0xff]  ;;  %v71_v26 = vand.u32 127, %v18_v1 }
   0x4   :  { %76 = vperm.xlu2 %203, %v16_v5   ;;  %204 = vset.pattern.permute.xlu0 %v249_v3  ;;  %v13_v8 = vld [vmem:[%s305_s0 + $0x8] sm:$0xff]  ;;  %v17_v9 = vld [vmem:[%s306_s1 + $0x10] sm:$0xff]  ;;  %v15_v14 = vld [vmem:[%s306_s1] sm:$0xff]  ;;  %s189_s21 = sshll.u32 %s307_s2, 4  ;;  %s250_s22 = smov [#allocation2]   ;;  %s190_s21 = int_to_ptr.hbm [resolvable:$true] %s189_s21 }
   0x5   :  { %v276_v7 = vadd.s32 16, %v19_v4  ;;  %v46_v11 = vsel %vm42_vm0, %v13_v8, -inf  ;;  %s187_s23 = sshll.u32 %s250_s22, 4  ;;  %s188_s23 = int_to_ptr.vmem [resolvable:$true] %s187_s23 }
   0x7   :  { %vm29_vm1 = vcmp.lt.s32.totalorder %v276_v7, 20 }
   0x8   :  { %v38_v10 = vsel %vm29_vm1, %v14_v6, 0.0  ;;  %v41_v13 = vsel %vm29_vm1, %v17_v9, 0 }
   0x9   :  { %v49_v12 = vsel %vm42_vm0, %v38_v10, -inf }
   0xa   :  { %50 = vmax.xlane.f32.xlu1 %v49_v12 }
   0xb   :  { %47 = vmax.xlane.f32.xlu0 %v46_v11 }
   0xc   :  { %79 = vperm.xlu2 %203, %v41_v13  }
  0x23   :  { %73 = vperm.xlu1 %202, %v15_v14  }
  0x5e   :  { %v77_v27 = vpop.permute.xlu2 %76 }
  0x5f   :  { %vm82_vm2 = vcmp.eq.s32.totalorder %v71_v26, %v77_v27 }
  0x66   :  { %v80_v35 = vpop.permute.xlu2 %79 }
  0x67   :  { %vm83_vm4 = vcmp.eq.s32.totalorder %v71_v26, %v80_v35 }
  0x76   :  { %v45_v15 = vpop.xlane.xlu0 %44 }
  0x77   :  { %v52_v16 = vsub.f32 %v12_v0, %v45_v15 }
  0x79   :  { %v55_v17 = vmul.f32 1.442695, %v52_v16 }
  0x7b   :  { %205 = vpow2.f32 %v55_v17 }
  0x7d   :  { %v51_v18 = vpop.xlane.xlu1 %50 }
  0x7e   :  { %v54_v19 = vsub.f32 %v38_v10, %v51_v18  ;;  %v48_v20 = vpop.xlane.xlu0 %47 }
  0x7f   :  { %v53_v21 = vsub.f32 %v13_v8, %v48_v20 }
  0x80   :  { %v59_v22 = vmul.f32 1.442695, %v54_v19 }
  0x81   :  { %v206_v23 = vpop.eup %205  ;;  %v57_v24 = vmul.f32 1.442695, %v53_v21 }
  0x82   :  { %207 = vpow2.f32 %v59_v22  ;;  %v61_v25 = vsel %vm42_vm0, %v206_v23, 0.0 }
  0x83   :  { %209 = vpow2.f32 %v57_v24  ;;  %62 = vadd.xlane.f32.xlu0 %v61_v25 }
  0x88   :  { %v208_v28 = vpop.eup %207 }
  0x89   :  { %v210_v29 = vpop.eup %209  ;;  %v67_v30 = vsel %vm42_vm0, %v208_v28, 0.0  ;;  %v86_v38 = vsel %vm83_vm4, %v208_v28, 0.0 }
  0x8a   :  { %v64_v31 = vsel %vm42_vm0, %v210_v29, 0.0  ;;  %v85_v32 = vsel %vm82_vm2, %v210_v29, 0.0  ;;  %v93_v39 = vsel %vm42_vm0, %v86_v38, 0.0  ;;  %vm165_vm2 = vcmask 7168  }
  0x8b   :  { %68 = vadd.xlane.f32.xlu0 %v67_v30  ;;  %65 = vadd.xlane.f32.xlu2 %v64_v31  ;;  %v90_v33 = vsel %vm42_vm0, %v85_v32, 0.0 }
  0x8c   :  { %91 = vadd.xlane.f32.xlu1 %v90_v33 }
  0x95   :  { %v74_v34 = vpop.permute.xlu1 %73 }
  0x96   :  { %vm81_vm3 = vcmp.eq.s32.totalorder %v71_v26, %v74_v34 }
  0x97   :  { %v84_v36 = vsel %vm81_vm3, %v206_v23, 0.0 }
  0x98   :  { %v87_v37 = vsel %vm42_vm0, %v84_v36, 0.0 }
  0x99   :  { %88 = vadd.xlane.f32.xlu0 %v87_v37 }
  0xa1   :  { %94 = vadd.xlane.f32.xlu0 %v93_v39 }
  0xf6   :  { %v63_v40 = vpop.xlane.xlu0 %62 }
  0xf7   :  { %211 = vrcp.f32 %v63_v40  ;;  %v107_v51 = vand.u32 2147483648, %v63_v40  ;;  %vm101_vm6 = vweird.f32 %v63_v40  ;;  %v105_v53 = vand.u32 2147483647, %v63_v40 }
  0xf9   :  { %v108_v60 = vor.u32 1.1754944e-38, %v107_v51  ;;  %vm106_vm9 = vcmp.eq.f32.partialorder %v105_v53, 8.507059e+37 }
  0xfd   :  { %v212_v41 = vpop.eup %211 }
  0xfe   :  { %v97_v42 = vmul.f32 %v212_v41, %v63_v40  ;;  %v66_v43 = vpop.xlane.xlu2 %65  ;;  %v69_v44 = vpop.xlane.xlu0 %68  ;;  %vm102_vm5 = vweird.f32 %v212_v41 }
  0xff   :  { %213 = vrcp.f32 %v66_v43  ;;  %vm103_vm7 = vmor %vm101_vm6, %vm102_vm5  ;;  %v122_v55 = vand.u32 2147483648, %v66_v43  ;;  %v120_v59 = vand.u32 2147483647, %v66_v43  ;;  %vm116_vm10 = vweird.f32 %v66_v43  ;;  %v92_v6 = vpop.xlane.xlu1 %91 }
 0x100   :  { %v98_v45 = vsub.f32 1.0, %v97_v42  ;;  %215 = vrcp.f32 %v69_v44  ;;  %v137_v5 = vand.u32 2147483648, %v69_v44  ;;  %vm131_vm14 = vweird.f32 %v69_v44 }
 0x101   :  { %v123_v1 = vor.u32 1.1754944e-38, %v122_v55  ;;  %vm121_vm13 = vcmp.eq.f32.partialorder %v120_v59, 8.507059e+37  ;;  %v135_v10 = vand.u32 2147483647, %v69_v44 }
 0x102   :  { %v99_v46 = vmul.f32 %v212_v41, %v98_v45  ;;  %v138_v14 = vor.u32 1.1754944e-38, %v137_v5 }
 0x103   :  { %vm136_vm0 = vcmp.eq.f32.partialorder %v135_v10, 8.507059e+37 }
 0x104   :  { %v100_v48 = vadd.f32 %v212_v41, %v99_v46 }
 0x105   :  { %v214_v47 = vpop.eup %213 }
 0x106   :  { %v216_v49 = vpop.eup %215  ;;  %v112_v50 = vmul.f32 %v214_v47, %v66_v43  ;;  %v104_v57 = vsel %vm103_vm7, %v212_v41, %v100_v48  ;;  %vm117_vm8 = vweird.f32 %v214_v47 }
 0x107   :  { %v127_v52 = vmul.f32 %v216_v49, %v69_v44  ;;  %v109_v63 = vsel %vm106_vm9, %v108_v60, %v104_v57  ;;  %vm118_vm11 = vmor %vm116_vm10, %vm117_vm8  ;;  %vm132_vm12 = vweird.f32 %v216_v49 }
 0x108   :  { %v113_v54 = vsub.f32 1.0, %v112_v50  ;;  %vm133_vm15 = vmor %vm131_vm14, %vm132_vm12 }
 0x109   :  { %v128_v56 = vsub.f32 1.0, %v127_v52 }
 0x10a   :  { %v114_v58 = vmul.f32 %v214_v47, %v113_v54 }
 0x10b   :  { %v129_v61 = vmul.f32 %v216_v49, %v128_v56 }
 0x10c   :  { %v115_v62 = vadd.f32 %v214_v47, %v114_v58  ;;  %v89_v0 = vpop.xlane.xlu0 %88 }
 0x10d   :  { %v110_v2 = vmul.f32 %v109_v63, %v89_v0  ;;  %v130_v3 = vadd.f32 %v216_v49, %v129_v61 }
 0x10e   :  { %v119_v4 = vsel %vm118_vm11, %v214_v47, %v115_v62 }
 0x10f   :  { %v124_v8 = vsel %vm121_vm13, %v123_v1, %v119_v4  ;;  %v150_v9 = vadd.f32 1e-10, %v110_v2  ;;  %v134_v12 = vsel %vm133_vm15, %v216_v49, %v130_v3  ;;  %v141_v18 = vsub.f32 1.0, %v110_v2 }
 0x110   :  { %v125_v11 = vmul.f32 %v124_v8, %v92_v6  ;;  %v139_v16 = vsel %vm136_vm0, %v138_v14, %v134_v12 }
 0x111   :  { %217 = vlog2.f32 %v150_v9  ;;  %v144_v24 = vmul.f32 %v141_v18, %v141_v18 }
 0x112   :  { %v151_v13 = vadd.f32 1e-10, %v125_v11  ;;  %v142_v15 = vsub.f32 1.0, %v125_v11 }
 0x113   :  { %v147_v31 = vsub.f32 0.0, %v144_v24 }
 0x114   :  { %219 = vlog2.f32 %v151_v13  ;;  %v95_v17 = vpop.xlane.xlu0 %94  ;;  %v145_v20 = vmul.f32 %v142_v15, %v142_v15 }
 0x115   :  { %v140_v19 = vmul.f32 %v139_v16, %v95_v17 }
 0x116   :  { %v148_v26 = vsub.f32 0.0, %v145_v20 }
 0x117   :  { %v152_v21 = vadd.f32 1e-10, %v140_v19  ;;  %v218_v22 = vpop.eup %217  ;;  %v143_v23 = vsub.f32 1.0, %v140_v19 }
 0x118   :  { %v154_v28 = vmul.f32 0.6931472, %v218_v22 }
 0x119   :  { %221 = vlog2.f32 %v152_v21  ;;  %v146_v29 = vmul.f32 %v143_v23, %v143_v23 }
 0x11a   :  { %v220_v25 = vpop.eup %219  ;;  %v159_v33 = vmul.f32 %v154_v28, %v147_v31 }
 0x11b   :  { %v156_v27 = vmul.f32 0.6931472, %v220_v25  ;;  %v149_v34 = vsub.f32 0.0, %v146_v29 }
 0x11c   :  { %v166_v38 = vsel %vm165_vm2, %v159_v33, 0.0 }
 0x11d   :  { %v160_v30 = vmul.f32 %v156_v27, %v148_v26 }
 0x11f   :  { %v222_v32 = vpop.eup %221  ;;  %v167_v36 = vsel %vm165_vm2, %v160_v30, 0.0 }
 0x120   :  { %v158_v35 = vmul.f32 0.6931472, %v222_v32  ;;  %v168_v40 = vadd.f32 %v167_v36, %v166_v38 }
 0x122   :  { %v161_v37 = vmul.f32 %v158_v35, %v149_v34 }
 0x124   :  { %v164_v39 = vsel %vm29_vm1, %v161_v37, 0.0 }
 0x125   :  { %v169_v41 = vsel %vm165_vm2, %v164_v39, 0.0 }
 0x126   :  { %v170_v42 = vadd.f32 %v169_v41, %v168_v40 }
 0x128   :  { %171 = vadd.xlane.f32.xlu0 %v170_v42 }
 0x19b   :  { %v172_v43 = vpop.xlane.xlu0 %171 }
 0x19c   :  { %v173_v44 = vrot.slane %v172_v43, 4 }
 0x19e   :  { %v174_v45 = vadd.f32 %v173_v44, %v172_v43 }
 0x1a0   :  { %v175_v46 = vrot.slane %v174_v45, 2 }
 0x1a2   :  { %v176_v47 = vadd.f32 %v175_v46, %v174_v45 }
 0x1a4   :  { %v177_v48 = vrot.slane %v176_v47, 1 }
 0x1a6   :  { %v178_v49 = vadd.f32 %v177_v48, %v176_v47 }
 0x1a8   :  { %198 = vpush %v178_v49 }
 0x1d9   :  { %s199_s24 = spop %198 }
 0x1da   :  { %v180_v7 = vstv %s199_s24 }
 0x1db   :  { %181 = vst [vmem:[#allocation2] sm:$0x1] %v180_v7 }
 0x1dc   :  { %192 = dma.vmem_to_hbm [thread:$0]  %s188_s23, 16, %s190_s21, [#allocation3]  }
 0x1dd   :  { %247 = dma.done.wait [#allocation3], 16  }
 0x1de   :  { %248 = vsyncadd [#allocation3], 4294967280 }
 0x1df   :  { %197 = vsyncpa [#allocation3], 1 }

</bundles_post_ra>
